<compile_context>
chip_gen: v6e
topology: v6e:2x2x1
jax: 0.10.0
libtpu: 0.0.40
codegen_flags: <defaults>
</compile_context>

<pallas_src>
import functools

import jax
import jax.numpy as jnp
from jax.experimental import pallas as pl
from jax.experimental.pallas import tpu as pltpu


def _round_up(x: int, m: int) -> int:
    return (x + m - 1) // m * m


def _gap_kernel(x_ref, o_ref, acc_ref, *, inv_hw: float):
    # x_ref:   (TM, TS) chunk of rows x spatial
    # o_ref:   (TM, 1)  per-row mean (written once, at the last spatial chunk)
    # acc_ref: (TM, 1)  f32 running row-sum accumulator (VMEM scratch)
    k = pl.program_id(1)

    @pl.when(k == 0)
    def _():
        acc_ref[...] = jnp.zeros_like(acc_ref)

    x = x_ref[...].astype(jnp.float32)
    ones = jnp.ones((x.shape[-1], 1), jnp.float32)
    # Row-sum via MXU (keeps the XLU slot free); hidden under the DMA stream.
    acc_ref[...] += jnp.dot(x, ones, preferred_element_type=jnp.float32)

    @pl.when(k == pl.num_programs(1) - 1)
    def _():
        o_ref[...] = (acc_ref[...] * inv_hw).astype(o_ref.dtype)


def _global_avg_pool2d_pallas(x):
    """x: (N, C, H, W) -> (N, C), mean over H and W (Pallas path)."""
    N, C, H, W = x.shape
    R, S = N * C, H * W
    x2 = x.reshape(R, S)

    itemsize = jnp.dtype(x.dtype).itemsize
    sublane = {4: 8, 2: 16, 1: 32}.get(itemsize, 8)

    # Row tile: up to 256 rows, multiple of the packed sublane count.
    TM = min(256, _round_up(R, sublane))
    R_pad = _round_up(R, TM)

    # Spatial chunk: multiple of 128, capped so one input tile is <= ~2 MiB
    # (<= ~4 MiB double-buffered) -> fits default scoped VMEM on v5e/v6e/v7x.
    budget_bytes = 2 * 1024 * 1024
    ts_cap = max(128, (budget_bytes // (TM * itemsize)) // 128 * 128)
    TS = min(ts_cap, _round_up(S, 128))
    S_pad = _round_up(S, TS)

    if (R_pad, S_pad) != (R, S):
        # Zero padding: does not perturb the sums; divisor is the true H*W.
        x2 = jnp.pad(x2, ((0, R_pad - R), (0, S_pad - S)))

    grid = (R_pad // TM, S_pad // TS)
    kernel = functools.partial(_gap_kernel, inv_hw=1.0 / float(S))

    out = pl.pallas_call(
        kernel,
        out_shape=jax.ShapeDtypeStruct((R_pad, 1), x.dtype),
        grid_spec=pltpu.PrefetchScalarGridSpec(
            num_scalar_prefetch=0,
            grid=grid,
            in_specs=[pl.BlockSpec((TM, TS), lambda i, k: (i, k))],
            out_specs=pl.BlockSpec((TM, 1), lambda i, k: (i, 0)),
            scratch_shapes=[pltpu.VMEM((TM, 1), jnp.float32)],
        ),
        compiler_params=pltpu.CompilerParams(
            dimension_semantics=("parallel", "arbitrary"),
        ),
    )(x2)

    return out[:R, 0].reshape(N, C)


def global_avg_pool2d(x, *, min_pallas_elems: int = 1 << 20):
    """(N, C, H, W) -> (N, C); matches F.avg_pool2d(x, (H, W)).view(N, C)."""
    N, C, H, W = x.shape
    if N * C * H * W < min_pallas_elems:
        # Tiny inputs: fixed pallas_call/grid-step overhead dominates; XLA's
        # fused reduce is faster.
        return jnp.mean(x, axis=(2, 3)).astype(x.dtype)
    return _global_avg_pool2d_pallas(x)


if __name__ == "__main__":
    key_small, key_med = jax.random.split(jax.random.PRNGKey(0))

    # Small shape from the module spec: exercise the Pallas kernel directly.
    N, C, H, W = 2, 4, 16, 16
    x_small = jax.random.normal(key_small, (N, C, H, W), dtype=jnp.float32)
    y_small = _global_avg_pool2d_pallas(x_small)
    jax.block_until_ready(y_small)
    ref_small = jnp.mean(x_small, axis=(2, 3))
    assert y_small.shape == (N, C)
    assert jnp.allclose(y_small, ref_small, atol=1e-5, rtol=1e-5)

    # Ragged, multi-tile shape: exercises row/spatial padding, a multi-step
    # "arbitrary" reduction axis (accumulator path), and the parallel row grid.
    N2, C2, H2, W2 = 2, 160, 48, 48
    x_med = jax.random.normal(key_med, (N2, C2, H2, W2), dtype=jnp.float32)
    y_med = _global_avg_pool2d_pallas(x_med)
    jax.block_until_ready(y_med)
    ref_med = jnp.mean(x_med, axis=(2, 3))
    assert y_med.shape == (N2, C2)
    assert jnp.allclose(y_med, ref_med, atol=1e-5, rtol=1e-5)

    # Public wrapper (takes the small-input fallback at this size).
    y_wrap = global_avg_pool2d(x_small)
    jax.block_until_ready(y_wrap)
    assert jnp.allclose(y_wrap, ref_small, atol=1e-5, rtol=1e-5)

    print("KERNEL_OK")
</pallas_src>

<mosaic_0001>
module attributes {stable_mosaic.version = 11 : i64} {
  func.func @_gap_kernel(%arg0: i32, %arg1: i32, %arg2: memref<8x256xf32, #tpu.memory_space<vmem>>, %arg3: memref<8x1xf32, #tpu.memory_space<vmem>>, %arg4: memref<8x1xf32, #tpu.memory_space<vmem>>) attributes {dimension_semantics = [#tpu.dimension_semantics<parallel>, #tpu.dimension_semantics<arbitrary>], iteration_bounds = array<i64: 1, 1>, scalar_prefetch = 0 : i64, scratch_operands = 1 : i64, tpu.core_type = #tpu.core_type<tc>, window_params = [{transform_indices = @transform_0, window_bounds = array<i64: 8, 256>}, {transform_indices = @transform_1, window_bounds = array<i64: 8, 1>}]} {
    %c0_i32 = arith.constant 0 : i32
    %0 = arith.cmpi eq, %arg1, %c0_i32 : i32
    %1 = arith.extui %0 : i1 to i32
    %c0_i32_0 = arith.constant 0 : i32
    %2 = arith.cmpi ne, %1, %c0_i32_0 : i32
    scf.if %2 {
      %cst_9 = arith.constant 0.000000e+00 : f32
      %12 = vector.broadcast %cst_9 : f32 to vector<8x1xf32>
      %c0_10 = arith.constant 0 : index
      %c0_11 = arith.constant 0 : index
      %13 = vector.load %arg4[%c0_10, %c0_11] : memref<8x1xf32, #tpu.memory_space<vmem>>, vector<8x1xf32>
      tpu.vector_store %arg4[%c0_10, %c0_11], %12 {strides = array<i32>} : memref<8x1xf32, #tpu.memory_space<vmem>>, vector<8x1xf32>,
    } else {
    }
    %c0 = arith.constant 0 : index
    %c0_1 = arith.constant 0 : index
    %3 = vector.load %arg2[%c0, %c0_1] : memref<8x256xf32, #tpu.memory_space<vmem>>, vector<8x256xf32>
    %cst = arith.constant 1.000000e+00 : f32
    %4 = vector.broadcast %cst : f32 to vector<256x1xf32>
    %c0_2 = arith.constant 0 : index
    %c0_3 = arith.constant 0 : index
    %5 = vector.load %arg4[%c0_2, %c0_3] : memref<8x1xf32, #tpu.memory_space<vmem>>, vector<8x1xf32>
    %cst_4 = arith.constant dense<0.000000e+00> : vector<8x1xf32>
    %6 = tpu.matmul %3, %4, %cst_4 {dimension_numbers = #tpu.dot_dimension_numbers<[1], [0], [0], [1], [0, 0, 1, 1], [], []>} : vector<8x256xf32>, vector<256x1xf32>, vector<8x1xf32> -> vector<8x1xf32>
    %7 = arith.addf %5, %6 : vector<8x1xf32>
    %c0_5 = arith.constant 0 : index
    %c0_6 = arith.constant 0 : index
    %8 = vector.load %arg4[%c0_5, %c0_6] : memref<8x1xf32, #tpu.memory_space<vmem>>, vector<8x1xf32>
    tpu.vector_store %arg4[%c0_5, %c0_6], %7 {strides = array<i32>} : memref<8x1xf32, #tpu.memory_space<vmem>>, vector<8x1xf32>,
    %c0_i32_7 = arith.constant 0 : i32
    %9 = arith.cmpi eq, %arg1, %c0_i32_7 : i32
    %10 = arith.extui %9 : i1 to i32
    %c0_i32_8 = arith.constant 0 : i32
    %11 = arith.cmpi ne, %10, %c0_i32_8 : i32
    scf.if %11 {
      %c0_9 = arith.constant 0 : index
      %c0_10 = arith.constant 0 : index
      %12 = vector.load %arg4[%c0_9, %c0_10] : memref<8x1xf32, #tpu.memory_space<vmem>>, vector<8x1xf32>
      %cst_11 = arith.constant 3.906250e-03 : f32
      %13 = vector.broadcast %cst_11 : f32 to vector<8x1xf32>
      %14 = arith.mulf %12, %13 : vector<8x1xf32>
      %c0_12 = arith.constant 0 : index
      %c0_13 = arith.constant 0 : index
      %15 = vector.load %arg3[%c0_12, %c0_13] : memref<8x1xf32, #tpu.memory_space<vmem>>, vector<8x1xf32>
      tpu.vector_store %arg3[%c0_12, %c0_13], %14 {strides = array<i32>} : memref<8x1xf32, #tpu.memory_space<vmem>>, vector<8x1xf32>,
    } else {
    }
    return
  }
  func.func @transform_0(%arg0: i32, %arg1: i32) -> (i32, i32) {
    %c0_i32 = arith.constant 0 : i32
    return %arg0, %arg1 : i32, i32
  }
  func.func @transform_1(%arg0: i32, %arg1: i32) -> (i32, i32) {
    %c0_i32 = arith.constant 0 : i32
    %c0_i32_0 = arith.constant 0 : i32
    return %arg0, %c0_i32 : i32, i32
  }
}

</mosaic_0001>

<bundles_post_ra>
// kernel: tpu_custom_call.1
= control target key start
LH: loop header
LB: loop body
LE: loop exit
PB: predicated region body
PF: predicated region fallthrough
CT: control target
= control target key end

     0   :  { %6 = vsyncpa [#allocation4], 0  ;;  %s173_s6 = smov [#allocation3]   ;;  %s195_s0 = inlined_call_operand.hbm [shape: f32[8,256], index: 0, kind: input, shape index: {}]   ;;  %s196_s1 = inlined_call_operand.vmem [shape: f32[8,1], index: 1, kind: output, shape index: {}]  }
   0x1   :  { %s13_s7 = sshll.u32 %s173_s6, 4  ;;  %s14_s7 = int_to_ptr.vmem [resolvable:$true] %s13_s7 }
   0x2   :  { %s159_s8 = scalar_lea.vmem %s14_s7, 256  ;;  %p164_p1 = scmp.lt.s32.totalorder %s14_s7, %s14_s7 }
   0x3   :  { %p160_p0 = scmp.ne.s32.totalorder %s14_s7, %s159_s8  ;;  %p165_p2 = scmp.lt.s32.totalorder %s159_s8, %s159_s8 }
   0x5   :  { %p166_p3 = por %p165_p2, %p164_p1 }
   0x7   :  { %p167_p4 = pnand %p166_p3, %p160_p0 }
   0x9   :  { %170 = shalt.err (!%p167_p4)
}
   0xa   :  { %16 = dma.hbm_to_vmem [thread:$0]  %s195_s0, 256, %s14_s7, [#allocation4]  }
   0xb   :  { %171 = dma.done.wait [#allocation4], 256  }
   0xc   :  { %172 = vsyncadd [#allocation4], 4294967040  ;;  %vm24_vm0 = vcmask 7168   ;;  %v174_v0 = vmov 1.0   ;;  %v175_v1 = vmov 0.0   ;;  %v27_v2 = vld [vmem:[#allocation3 + $0x8] sm:$0xff] }
   0xd   :  { %113 = vmatprep.subr.mxu0 %v174_v0  ;;  %25 = vst.msk [vmem:[#allocation2] sm:$0xff] %vm24_vm0, %v175_v1  ;;  %93 = vmatprep.mubr.f32.mxu0 %v27_v2  ;;  %v26_v3 = vld [vmem:[#allocation3] sm:$0xff] }
   0xe   :  { %114 = vmatpush3.msra.mxu0 %v174_v0 }
   0xf   :  { %115 = vmatprep.subr.mxu0 %v174_v0 }
  0x10   :  { %116 = vmatpush3.msra.mxu0 %v174_v0 }
  0x11   :  { %117 = vmatprep.subr.mxu0 %v174_v0 }
  0x12   :  { %118 = vmatpush3.msra.mxu0 %v174_v0 }
  0x13   :  { %119 = vmatprep.subr.mxu0 %v174_v0 }
  0x14   :  { %120 = vmatpush3.msra.mxu0 %v174_v0  ;;  %v28_v5 = vld [vmem:[#allocation2] sm:$0xff] }
  0x15   :  { %121 = vmatprep.subr.mxu0 %v174_v0 }
  0x16   :  { %122 = vmatpush3.msra.mxu0 %v174_v0 }
  0x17   :  { %123 = vmatprep.subr.mxu0 %v174_v0 }
  0x18   :  { %124 = vmatpush3.msra.mxu0 %v174_v0 }
  0x19   :  { %125 = vmatprep.subr.mxu0 %v174_v0 }
  0x1a   :  { %126 = vmatpush3.msra.mxu0 %v174_v0 }
  0x1b   :  { %127 = vmatprep.subr.mxu0 %v174_v0 }
  0x1c   :  { %128 = vmatpush3.msra.mxu0 %v174_v0 }
  0x1d   :  { %129 = vmatprep.subr.mxu0 %v174_v0 }
  0x1e   :  { %130 = vmatpush3.msra.mxu0 %v174_v0 }
  0x1f   :  { %131 = vmatprep.subr.mxu0 %v174_v0 }
  0x20   :  { %132 = vmatpush3.msra.mxu0 %v174_v0 }
  0x21   :  { %133 = vmatprep.subr.mxu0 %v174_v0 }
  0x22   :  { %134 = vmatpush3.msra.mxu0 %v174_v0 }
  0x23   :  { %135 = vmatprep.subr.mxu0 %v174_v0 }
  0x24   :  { %136 = vmatpush3.msra.mxu0 %v174_v0 }
  0x25   :  { %137 = vmatprep.subr.mxu0 %v174_v0 }
  0x26   :  { %138 = vmatpush3.msra.mxu0 %v174_v0 }
  0x27   :  { %139 = vmatprep.subr.mxu0 %v174_v0 }
  0x28   :  { %140 = vmatpush3.msra.mxu0 %v174_v0 }
  0x29   :  { %141 = vmatprep.subr.mxu0 %v174_v0 }
  0x2a   :  { %142 = vmatpush3.msra.mxu0 %v174_v0 }
  0x2b   :  { %143 = vmatprep.subr.mxu0 %v174_v0 }
  0x2c   :  { %144 = vmatpush3.msra.mxu0 %v174_v0 }
  0x2d   :  { %94 = vmatmul.mubr.f32.vlgmr.msra.gmra.mxu0 %v26_v3 }
  0xed   :  { %v145_v4 = vpop.f32.mrf.mxu0 }
  0xef   :  { %v146_v6 = vpop.f32.mrf.mxu0 }
  0xf0   :  { %v147_v7 = vadd.f32 %v146_v6, %v145_v4 }
  0xf2   :  { %v99_v8 = vadd.f32 %v147_v7, %v28_v5 }
  0xf4   :  { %101 = vst.msk [vmem:[#allocation2] sm:$0xff] %vm24_vm0, %v99_v8 }
  0xfb   :  { %v105_v9 = vld [vmem:[#allocation2] sm:$0xff] }
  0xfc   :  { %v106_v10 = vmul.f32 0.00390625, %v105_v9 }
  0xfe   :  { %107 = vst.msk [vmem:[%s196_s1] sm:$0xff] %vm24_vm0, %v106_v10 }
  0xff   :  { %112 = vsyncpa [#allocation4], 1 }

</bundles_post_ra>
